<compile_context>
chip_gen: v5e
topology: v5e:2x2
jax: 0.10.0
libtpu: 0.0.40
codegen_flags: <defaults>
</compile_context>

<pallas_src>
import functools

import jax
import jax.numpy as jnp
from jax.experimental import pallas as pl
from jax.experimental.pallas import tpu as pltpu


_TARGET_TILE_BYTES = 2 << 20  # ~2 MiB per input tile (double-buffered by Pallas)


def _pow_static(x, p):
    """x**p with a VPU-only fast path for small static positive integer p."""
    p = float(p)
    if p == float(int(p)) and 1 <= int(p) <= 16:
        n = int(p)
        result = None
        base = x
        while n > 0:
            if n & 1:
                result = base if result is None else result * base
            n >>= 1
            if n:
                base = base * base
        return result
    return x ** p  # fallback: EUP exp/log per element


def _gem_kernel_simple(x_ref, o_ref, *, p, inv_p, inv_s, eps):
    # x_ref: (tile_r, S) tile in VMEM; o_ref: (tile_r, 1).
    x = x_ref[...].astype(jnp.float32)
    xp = _pow_static(jnp.maximum(x, eps), p)            # clamp(min=eps).pow(p)
    m = jnp.sum(xp, axis=-1, keepdims=True) * inv_s     # global avg pool -> (1,1)
    o_ref[...] = (m ** inv_p).astype(o_ref.dtype)       # .pow(1/p), once per row


def _gem_kernel_acc(x_ref, o_ref, acc_ref, *, p, inv_p, inv_s, eps, s_valid, tile_s):
    # Spatial (reduction) grid axis is last; f32 accumulator persists across it.
    j = pl.program_id(1)

    @pl.when(j == 0)
    def _():
        acc_ref[...] = jnp.zeros_like(acc_ref)

    x = x_ref[...].astype(jnp.float32)
    xc = jnp.maximum(x, eps)
    if s_valid % tile_s != 0:
        # Ragged last spatial tile: zero out-of-range columns so they do not
        # contribute to the sum (cheap VPU select; the kernel is HBM-bound).
        col = jax.lax.broadcasted_iota(jnp.int32, xc.shape, 1) + j * tile_s
        xc = jnp.where(col < s_valid, xc, 0.0)
    acc_ref[...] += jnp.sum(_pow_static(xc, p), axis=-1, keepdims=True)

    @pl.when(j == pl.num_programs(1) - 1)
    def _():
        m = acc_ref[...] * inv_s
        o_ref[...] = (m ** inv_p).astype(o_ref.dtype)


def adaptive_gem2d(x, output_size=(1, 1), p=3.0, eps=1e-6, *, _force_tile_s=None):
    """GeM pooling: F.adaptive_avg_pool2d(x.clamp(min=eps).pow(p), (1,1)).pow(1/p)."""
    # TODO(synk): only output_size=(1,1) (global GeM) is implemented; general
    # adaptive output sizes would need per-bin windowed means.
    assert tuple(output_size) == (1, 1), "only global (1,1) GeM pooling implemented"
    N, C, H, W = x.shape
    R, S = N * C, H * W
    xf = x.reshape(R, S)
    elt = xf.dtype.itemsize

    p = float(p)
    kwargs = dict(p=p, inv_p=1.0 / p, inv_s=1.0 / float(S), eps=float(eps))
    int_p = (p == float(int(p)) and 1 <= int(p) <= 16)

    needs_spatial_tiling = (_force_tile_s is not None) or (8 * S * elt > _TARGET_TILE_BYTES)

    cost = pl.CostEstimate(
        flops=4 * R * S + 2 * R,
        transcendentals=(0 if int_p else 2 * R * S) + 2 * R,
        bytes_accessed=R * S * elt + R * elt,
    )

    if not needs_spatial_tiling:
        # Rows-only grid: full spatial extent per tile.
        tile_r = max(8, (_TARGET_TILE_BYTES // max(1, S * elt)) // 8 * 8)
        if tile_r >= R:
            tile_r = R  # full-dim block is always legal (no multiple-of-8 needed)
        out = pl.pallas_call(
            functools.partial(_gem_kernel_simple, **kwargs),
            out_shape=jax.ShapeDtypeStruct((R, 1), x.dtype),
            grid=(pl.cdiv(R, tile_r),),
            in_specs=[pl.BlockSpec((tile_r, S), lambda i: (i, 0))],
            out_specs=pl.BlockSpec((tile_r, 1), lambda i: (i, 0)),
            compiler_params=pltpu.CompilerParams(
                dimension_semantics=("parallel",)),
            cost_estimate=cost,
        )(xf)
    else:
        # Rows (parallel) x spatial (arbitrary, reduction-last) grid with an
        # f32 accumulator resident across the spatial axis.
        tile_r = 64
        if tile_r >= R:
            tile_r = R
        if _force_tile_s is not None:
            tile_s = int(_force_tile_s)
        else:
            tile_s = max(128, (_TARGET_TILE_BYTES // max(1, tile_r * elt)) // 128 * 128)
        if tile_s >= S:
            tile_s = S  # single spatial block; full-dim block is always legal
        out = pl.pallas_call(
            functools.partial(_gem_kernel_acc, s_valid=S, tile_s=tile_s, **kwargs),
            out_shape=jax.ShapeDtypeStruct((R, 1), x.dtype),
            grid=(pl.cdiv(R, tile_r), pl.cdiv(S, tile_s)),
            in_specs=[pl.BlockSpec((tile_r, tile_s), lambda i, j: (i, j))],
            out_specs=pl.BlockSpec((tile_r, 1), lambda i, j: (i, 0)),
            scratch_shapes=[pltpu.VMEM((tile_r, 1), jnp.float32)],
            compiler_params=pltpu.CompilerParams(
                dimension_semantics=("parallel", "arbitrary")),
            cost_estimate=cost,
        )(xf)

    return out.reshape(N, C, 1, 1)


class AdaptiveGeM2d:
    """JAX/Pallas port of the PyTorch AdaptiveGeM2d module (forward pass)."""

    def __init__(self, output_size=(1, 1), p=3.0, eps=1e-6, freeze_p=True):
        self.output_size = output_size
        # freeze_p=True -> p is a plain float; otherwise a 1-element array
        # initialized to ones(1)*p (mirroring the Parameter init).
        # TODO(synk): for a truly learnable p, pass it as an SMEM scalar input
        # with a custom VJP instead of baking it in (the current path forces a
        # host sync + recompile whenever p changes).
        self.p = float(p) if freeze_p else jnp.ones((1,), jnp.float32) * p
        self.eps = eps
        self.freeze_p = freeze_p

    def __call__(self, x):
        p_val = self.p if self.freeze_p else float(self.p[0])
        return adaptive_gem2d(x, self.output_size, p=p_val, eps=self.eps)


if __name__ == "__main__":
    def ref_gem(x, p=3.0, eps=1e-6):
        return jnp.mean(jnp.maximum(x, eps) ** p, axis=(2, 3), keepdims=True) ** (1.0 / p)

    # 1) Default (rows-only) path.
    x1 = jax.random.normal(jax.random.PRNGKey(0), (2, 4, 16, 16), dtype=jnp.float32)
    mod = AdaptiveGeM2d(output_size=(1, 1), p=3.0, eps=1e-6, freeze_p=True)
    y1 = jax.block_until_ready(mod(x1))
    assert y1.shape == (2, 4, 1, 1)
    assert jnp.allclose(y1, ref_gem(x1), atol=1e-5, rtol=1e-4)

    # 2) Spatial-accumulator path (forced small tile_s to exercise the reduction
    #    grid axis and the ragged-spatial-tile mask: S=324, tile_s=128).
    x2 = jax.random.normal(jax.random.PRNGKey(0), (2, 8, 18, 18), dtype=jnp.float32)
    y2 = jax.block_until_ready(adaptive_gem2d(x2, p=3.0, eps=1e-6, _force_tile_s=128))
    assert y2.shape == (2, 8, 1, 1)
    assert jnp.allclose(y2, ref_gem(x2), atol=1e-5, rtol=1e-4)

    print("KERNEL_OK")
</pallas_src>

<mosaic_0001>
module attributes {stable_mosaic.version = 11 : i64} {
  func.func @_gem_kernel_simple(%arg0: i32, %arg1: memref<8x256xf32, #tpu.memory_space<vmem>>, %arg2: memref<8x1xf32, #tpu.memory_space<vmem>>) attributes {dimension_semantics = [#tpu.dimension_semantics<parallel>], iteration_bounds = array<i64: 1>, scalar_prefetch = 0 : i64, scratch_operands = 0 : i64, tpu.core_type = #tpu.core_type<tc>, window_params = [{transform_indices = @transform_0, window_bounds = array<i64: 8, 256>}, {transform_indices = @transform_1, window_bounds = array<i64: 8, 1>}]} {
    %c0 = arith.constant 0 : index
    %c0_0 = arith.constant 0 : index
    %0 = vector.load %arg1[%c0, %c0_0] : memref<8x256xf32, #tpu.memory_space<vmem>>, vector<8x256xf32>
    %cst = arith.constant 9.99999997E-7 : f32
    %1 = vector.broadcast %cst : f32 to vector<8x256xf32>
    %2 = arith.maximumf %0, %1 : vector<8x256xf32>
    %3 = arith.mulf %2, %2 : vector<8x256xf32>
    %4 = arith.mulf %2, %3 : vector<8x256xf32>
    %cst_1 = arith.constant dense<0.000000e+00> : vector<8xf32>
    %5 = vector.multi_reduction <add>, %4, %cst_1 [1] : vector<8x256xf32> to vector<8xf32>
    %6 = vector.shape_cast %5 : vector<8xf32> to vector<8x1xf32>
    %cst_2 = arith.constant 3.906250e-03 : f32
    %7 = vector.broadcast %cst_2 : f32 to vector<8x1xf32>
    %8 = arith.mulf %6, %7 : vector<8x1xf32>
    %cst_3 = arith.constant 0.333333343 : f32
    %9 = vector.broadcast %cst_3 : f32 to vector<8x1xf32>
    %10 = math.powf %8, %9 : vector<8x1xf32>
    %c0_4 = arith.constant 0 : index
    %c0_5 = arith.constant 0 : index
    %11 = vector.load %arg2[%c0_4, %c0_5] : memref<8x1xf32, #tpu.memory_space<vmem>>, vector<8x1xf32>
    tpu.vector_store %arg2[%c0_4, %c0_5], %10 {strides = array<i32>} : memref<8x1xf32, #tpu.memory_space<vmem>>, vector<8x1xf32>,
    return
  }
  func.func @transform_0(%arg0: i32) -> (i32, i32) {
    %c0_i32 = arith.constant 0 : i32
    %c0_i32_0 = arith.constant 0 : i32
    return %arg0, %c0_i32 : i32, i32
  }
  func.func @transform_1(%arg0: i32) -> (i32, i32) {
    %c0_i32 = arith.constant 0 : i32
    %c0_i32_0 = arith.constant 0 : i32
    return %arg0, %c0_i32 : i32, i32
  }
}

</mosaic_0001>

<bundles_post_ra>
// kernel: tpu_custom_call.1
= control target key start
LH: loop header
LB: loop body
LE: loop exit
PB: predicated region body
PF: predicated region fallthrough
CT: control target
= control target key end

     0   :  { %6 = vsyncpa [#allocation3], 0  ;;  %s97_s9 = smov [#allocation2]   ;;  %s114_s0 = inlined_call_operand.hbm [shape: f32[8,256], index: 0, kind: input, shape index: {}]   ;;  %s115_s1 = inlined_call_operand.vmem [shape: f32[8,1], index: 1, kind: output, shape index: {}]  }
   0x1   :  { %s12_s8 = sshll.u32 %s114_s0, 4  ;;  %s14_s10 = sshll.u32 %s97_s9, 4  ;;  %s13_s8 = int_to_ptr.hbm [resolvable:$true] %s12_s8  ;;  %s15_s10 = int_to_ptr.vmem [resolvable:$true] %s14_s10 }
   0x2   :  { %17 = dma.hbm_to_vmem [thread:$0]  %s13_s8, 256, %s15_s10, [#allocation3]  }
   0x3   :  { %95 = dma.done.wait [#allocation3], 256  }
   0x4   :  { %96 = vsyncadd [#allocation3], 4294967040  ;;  %v22_v0 = vld [vmem:[#allocation2] sm:$0xff]  ;;  %v23_v1 = vld [vmem:[#allocation2 + $0x8] sm:$0xff]  ;;  %vm35_vm4 = vcmask 7168  }
   0x5   :  { %v24_v2 = vmax.f32 %v22_v0, 1e-06  ;;  %v25_v3 = vmax.f32 %v23_v1, 1e-06 }
   0x7   :  { %v26_v4 = vmul.f32 %v24_v2, %v24_v2  ;;  %v27_v5 = vmul.f32 %v25_v3, %v25_v3 }
   0x9   :  { %v28_v6 = vmul.f32 %v26_v4, %v24_v2  ;;  %v29_v7 = vmul.f32 %v27_v5, %v25_v3 }
   0xb   :  { %v30_v8 = vadd.f32 %v29_v7, %v28_v6 }
   0xd   :  { %31 = vadd.xlane.f32.xlu0 %v30_v8 }
  0x80   :  { %v32_v9 = vpop.xlane.xlu0 %31 }
  0x81   :  { %v33_v10 = vmul.f32 0.00390625, %v32_v9 }
  0x83   :  { %v44_v11 = vand.u32 2147483647, %v33_v10  ;;  %v61_v23 = vand.u32 2147483648, %v33_v10  ;;  %vm43_vm2 = vcmp.lt.f32.partialorder %v33_v10, 0.0  ;;  %vm42_vm3 = vcmp.eq.f32.partialorder %v33_v10, 0.0 }
  0x85   :  { %67 = vlog2.f32 %v44_v11  ;;  %vm58_vm0 = vweird.f32 %v44_v11  ;;  %vm60_vm1 = vcmp.eq.f32.partialorder %v44_v11, 0.0  ;;  %vm45_vm5 = vcmp.eq.f32.partialorder %v44_v11, inf }
  0x8b   :  { %v68_v12 = vpop.eup %67 }
  0x8c   :  { %v48_v13 = vmul.f32 -0.33333334, %v68_v12 }
  0x8e   :  { %69 = vpow2.f32 %v48_v13 }
  0x94   :  { %v70_v14 = vpop.eup %69 }
  0x95   :  { %v50_v15 = vmul.f32 %v70_v14, %v70_v14 }
  0x97   :  { %v51_v16 = vmul.f32 %v50_v15, %v44_v11 }
  0x99   :  { %v52_v17 = vmul.f32 %v51_v16, %v50_v15 }
  0x9b   :  { %v53_v18 = vsub.f32 %v52_v17, %v70_v14 }
  0x9d   :  { %v54_v19 = vmul.f32 -0.33333334, %v53_v18 }
  0x9f   :  { %v55_v20 = vadd.f32 %v70_v14, %v54_v19 }
  0xa1   :  { %v56_v21 = vmul.f32 %v55_v20, %v33_v10 }
  0xa3   :  { %v57_v22 = vmul.f32 %v56_v21, %v55_v20 }
  0xa5   :  { %v59_v24 = vsel %vm58_vm0, %v33_v10, %v57_v22 }
  0xa6   :  { %v62_v25 = vsel %vm60_vm1, %v61_v23, %v59_v24 }
  0xa7   :  { %v63_v26 = vsel %vm43_vm2, nan, %v62_v25 }
  0xa8   :  { %v64_v27 = vsel %vm42_vm3, 0.0, %v63_v26 }
  0xa9   :  { %v65_v28 = vsel %vm45_vm5, inf, %v64_v27 }
  0xaa   :  { %36 = vst.msk [vmem:[%s115_s1] sm:$0xff] %vm35_vm4, %v65_v28 }
  0xab   :  { %41 = vsyncpa [#allocation3], 1 }

</bundles_post_ra>
